<compile_context>
chip_gen: v6e
topology: v6e:2x2x1
jax: 0.10.0
libtpu: 0.0.40
codegen_flags: <defaults>
</compile_context>

<pallas_src>
import functools

import jax
import jax.numpy as jnp
from jax.experimental import pallas as pl
from jax.experimental.pallas import tpu as pltpu

BN_EPS = 1e-5
LEAKY_SLOPE = 0.01  # nn.LeakyReLU() default negative_slope


def _round_up(x, m):
    return (x + m - 1) // m * m


# ---------------------------------------------------------------------------
# Kernel
# ---------------------------------------------------------------------------
def fc_layer_kernel(x_ref, w_ref, bng_ref, o_ref, *, tk, x_resident):
    """One (out_ch tile j, K tile k) grid step.

    x_ref  : (B, k_pad) bf16 if x_resident else (B, tk) bf16
    w_ref  : (tk, tn)   bf16
    bng_ref: (3, tn)    f32   rows = [bias, gamma, beta]
    o_ref  : (B, tn)    f32   resident across k -> doubles as the f32 accumulator
    """
    k = pl.program_id(1)

    @pl.when(k == 0)
    def _init():
        o_ref[...] = jnp.zeros_like(o_ref)

    if x_resident:
        start = pl.multiple_of(k * tk, tk)
        x_blk = x_ref[:, pl.ds(start, tk)]
    else:
        x_blk = x_ref[...]

    # bf16 MXU matmul, f32 accumulation directly into the resident output block.
    o_ref[...] += jnp.dot(x_blk, w_ref[...], preferred_element_type=jnp.float32)

    # Epilogue only after the full contraction: bias + BatchNorm1d (training
    # mode: biased batch variance) + LeakyReLU, fused with minimal (B, tn)
    # temporaries, single lane-dense f32 store per out_ch tile.
    @pl.when(k == pl.num_programs(1) - 1)
    def _finalize():
        bng = bng_ref[...]                                  # (3, tn)
        y = o_ref[...] + bng[0:1, :]                        # Linear bias
        mean = jnp.mean(y, axis=0, keepdims=True)           # batch stats (XLU)
        c = y - mean
        var = jnp.mean(c * c, axis=0, keepdims=True)        # biased variance
        scale = bng[1:2, :] * jax.lax.rsqrt(var + BN_EPS)   # gamma/std (EUP rsqrt)
        z = scale * c + bng[2:3, :]                         # fused normalize+affine
        o_ref[...] = jnp.where(z >= 0.0, z, LEAKY_SLOPE * z)


# ---------------------------------------------------------------------------
# Planning (one-time, per shape): generation-aware + B-aware tile derating
# ---------------------------------------------------------------------------
def plan_fc_layer(B, in_ch, out_ch, *, tn_max=1024, tk_max=512):
    k128 = _round_up(in_ch, 128)
    n128 = _round_up(out_ch, 128)

    try:
        vmem_cap = int(pltpu.get_tpu_info().vmem_capacity_bytes)
    except Exception:
        vmem_cap = 64 * 1024 * 1024  # be conservative: v7x has the smallest VMEM
    vmem_limit = min(vmem_cap * 3 // 4, 96 * 1024 * 1024)
    budget = vmem_limit // 2  # per-step tile footprint budget (headroom for temps)

    tn = min(tn_max, n128)
    tk = min(tk_max, k128)

    # v7x megacore: expose >=2 "parallel" out_ch tiles when out_ch allows.
    if n128 // tn < 2 and n128 > 128:
        tn = _round_up(n128 // 2, 128)

    def footprint(tn_, tk_, resident):
        x_b = 2 * B * (_round_up(in_ch, tk_) if resident else tk_) * 2  # bf16 x
        w_b = 2 * tk_ * tn_ * 2                                          # bf16 W
        o_b = 2 * B * tn_ * 4                                            # f32 out/acc
        p_b = 2 * 3 * tn_ * 4                                            # packed BN params
        return x_b + w_b + o_b + p_b

    # B-aware derating: shrink tiles until the footprint fits the budget.
    while True:
        if footprint(tn, tk, True) <= budget:
            x_resident = True
            break
        if footprint(tn, tk, False) <= budget:
            x_resident = False
            break
        if tn > 128:
            tn = max(128, tn // 2)
        elif tk > 128:
            tk = max(128, tk // 2)
        else:
            # TODO(synk): for very large B even 128x128 tiles exceed VMEM; tile B
            # and accumulate per-column sum / sum-of-squares with a second
            # normalization pass.
            x_resident = False
            break

    return dict(B=B, in_ch=in_ch, out_ch=out_ch, tn=tn, tk=tk,
                n_pad=_round_up(out_ch, tn), k_pad=_round_up(in_ch, tk),
                x_resident=x_resident, vmem_limit=vmem_limit)


def prepare_fc_params(plan, w, b, gamma, beta):
    """One-time parameter packing: pad + cast W to bf16, pack [bias;gamma;beta].

    w: (in_ch, out_ch) f32 (transpose PyTorch's (out_ch, in_ch) once, outside).
    """
    in_ch, out_ch = plan["in_ch"], plan["out_ch"]
    k_pad, n_pad = plan["k_pad"], plan["n_pad"]
    w_p = jnp.pad(w, ((0, k_pad - in_ch), (0, n_pad - out_ch))).astype(jnp.bfloat16)
    bng = jnp.stack([b, gamma, beta]).astype(jnp.float32)        # (3, out_ch)
    bng_p = jnp.pad(bng, ((0, 0), (0, n_pad - out_ch)))          # padded cols -> 0
    return w_p, bng_p


# ---------------------------------------------------------------------------
# Forward wrapper
# ---------------------------------------------------------------------------
def fc_layer_forward(plan, w_p, bng_p, x):
    """x: (B, in_ch) float -> (B, out_ch) f32."""
    B, in_ch = x.shape
    assert B == plan["B"] and in_ch == plan["in_ch"]
    tn, tk = plan["tn"], plan["tk"]
    n_pad, k_pad = plan["n_pad"], plan["k_pad"]
    x_resident = plan["x_resident"]

    # bf16 x halves activation HBM traffic; accumulation stays f32 in-kernel.
    x = x.astype(jnp.bfloat16)
    if k_pad != in_ch:
        x = jnp.pad(x, ((0, 0), (0, k_pad - in_ch)))  # zero K-pad: exact no-op

    if x_resident:
        # Constant index_map: x is DMA'd once and stays resident for the whole grid.
        x_spec = pl.BlockSpec((B, k_pad), lambda j, k: (0, 0))
    else:
        x_spec = pl.BlockSpec((B, tk), lambda j, k: (0, k))

    kernel = functools.partial(fc_layer_kernel, tk=tk, x_resident=x_resident)

    out = pl.pallas_call(
        kernel,
        out_shape=jax.ShapeDtypeStruct((B, n_pad), jnp.float32),
        grid_spec=pltpu.PrefetchScalarGridSpec(
            num_scalar_prefetch=0,
            grid=(n_pad // tn, k_pad // tk),  # (out_ch tiles [parallel], K [arbitrary])
            in_specs=[
                x_spec,
                pl.BlockSpec((tk, tn), lambda j, k: (k, j)),   # bf16 W tile
                pl.BlockSpec((3, tn), lambda j, k: (0, j)),    # [bias;gamma;beta]
            ],
            out_specs=pl.BlockSpec((B, tn), lambda j, k: (0, j)),
        ),
        compiler_params=pltpu.CompilerParams(
            dimension_semantics=("parallel", "arbitrary"),
            vmem_limit_bytes=plan["vmem_limit"],
        ),
    )(x, w_p, bng_p)

    return out[:, :plan["out_ch"]]


# ---------------------------------------------------------------------------
# Pure-JAX reference
# ---------------------------------------------------------------------------
def reference_forward(x, w, b, gamma, beta, matmul_dtype=None):
    if matmul_dtype is not None:
        y = jnp.dot(x.astype(matmul_dtype), w.astype(matmul_dtype),
                    preferred_element_type=jnp.float32)
    else:
        y = jnp.dot(x, w, precision=jax.lax.Precision.HIGHEST)
    y = y + b.reshape(1, -1)
    mean = jnp.mean(y, axis=0, keepdims=True)
    var = jnp.mean((y - mean) ** 2, axis=0, keepdims=True)
    z = gamma.reshape(1, -1) * (y - mean) / jnp.sqrt(var + BN_EPS) + beta.reshape(1, -1)
    return jnp.where(z >= 0.0, z, LEAKY_SLOPE * z)


if __name__ == "__main__":
    key = jax.random.PRNGKey(0)
    # (B, in_ch, out_ch): single-tile, padded/2-j-tile, and multi-K-step cases.
    configs = [(8, 32, 64), (16, 200, 300), (16, 640, 256)]

    for B, in_ch, out_ch in configs:
        key, kx, kw, kb, kg, kbeta = jax.random.split(key, 6)
        x = jax.random.normal(kx, (B, in_ch), dtype=jnp.float32)

        # PyTorch-like uniform(-1/sqrt(in_ch), 1/sqrt(in_ch)) init for Linear.
        bound = 1.0 / jnp.sqrt(jnp.float32(in_ch))
        w = jax.random.uniform(kw, (in_ch, out_ch), jnp.float32, -bound, bound)
        b = jax.random.uniform(kb, (out_ch,), jnp.float32, -bound, bound)
        gamma = jnp.ones((out_ch,), jnp.float32) + 0.1 * jax.random.normal(kg, (out_ch,))
        beta = 0.1 * jax.random.normal(kbeta, (out_ch,), dtype=jnp.float32)

        plan = plan_fc_layer(B, in_ch, out_ch)
        w_p, bng_p = prepare_fc_params(plan, w, b, gamma, beta)   # one-time prep
        out = jax.block_until_ready(fc_layer_forward(plan, w_p, bng_p, x))

        assert out.shape == (B, out_ch)
        assert bool(jnp.all(jnp.isfinite(out)))

        # 1) Against the full-f32 reference (module semantics), bf16-matmul tolerance.
        ref_f32 = reference_forward(x, w, b, gamma, beta)
        assert jnp.allclose(out, ref_f32, atol=5e-2, rtol=5e-2), (B, in_ch, out_ch)

        # 2) Against the matched mixed-precision reference (tight tolerance).
        ref_mixed = reference_forward(x, w, b, gamma, beta, matmul_dtype=jnp.bfloat16)
        assert jnp.allclose(out, ref_mixed, atol=2e-3, rtol=2e-3), (B, in_ch, out_ch)

    print("KERNEL_OK")
</pallas_src>

<mosaic_0001>
module attributes {stable_mosaic.version = 11 : i64} {
  func.func @fc_layer_kernel(%arg0: i32, %arg1: i32, %arg2: memref<8x128xbf16, #tpu.memory_space<vmem>>, %arg3: memref<128x128xbf16, #tpu.memory_space<vmem>>, %arg4: memref<3x128xf32, #tpu.memory_space<vmem>>, %arg5: memref<8x128xf32, #tpu.memory_space<vmem>>) attributes {dimension_semantics = [#tpu.dimension_semantics<parallel>, #tpu.dimension_semantics<arbitrary>], iteration_bounds = array<i64: 1, 1>, scalar_prefetch = 0 : i64, scratch_operands = 0 : i64, tpu.core_type = #tpu.core_type<tc>, window_params = [{pipeline_mode = #tpu.pipeline_mode<synchronous>, transform_indices = @transform_0, window_bounds = array<i64: 8, 128>}, {transform_indices = @transform_1, window_bounds = array<i64: 128, 128>}, {transform_indices = @transform_2, window_bounds = array<i64: 3, 128>}, {transform_indices = @transform_3, window_bounds = array<i64: 8, 128>}]} {
    %c0_i32 = arith.constant 0 : i32
    %0 = arith.cmpi eq, %arg1, %c0_i32 : i32
    %1 = arith.extui %0 : i1 to i32
    %c0_i32_0 = arith.constant 0 : i32
    %2 = arith.cmpi ne, %1, %c0_i32_0 : i32
    scf.if %2 {
      %cst_9 = arith.constant 0.000000e+00 : f32
      %15 = vector.broadcast %cst_9 : f32 to vector<8x128xf32>
      %c0_10 = arith.constant 0 : index
      %c0_11 = arith.constant 0 : index
      %16 = vector.load %arg5[%c0_10, %c0_11] : memref<8x128xf32, #tpu.memory_space<vmem>>, vector<8x128xf32>
      tpu.vector_store %arg5[%c0_10, %c0_11], %15 {strides = array<i32>} : memref<8x128xf32, #tpu.memory_space<vmem>>, vector<8x128xf32>,
    } else {
    }
    %c128_i32 = arith.constant 128 : i32
    %3 = arith.muli %arg1, %c128_i32 : i32
    %4 = tpu.assume_multiple %3, 128 : i32
    %c0 = arith.constant 0 : index
    %5 = arith.index_cast %4 : i32 to index
    %6 = vector.load %arg2[%c0, %5] : memref<8x128xbf16, #tpu.memory_space<vmem>>, vector<8x128xbf16>
    %c0_1 = arith.constant 0 : index
    %c0_2 = arith.constant 0 : index
    %7 = vector.load %arg5[%c0_1, %c0_2] : memref<8x128xf32, #tpu.memory_space<vmem>>, vector<8x128xf32>
    %c0_3 = arith.constant 0 : index
    %c0_4 = arith.constant 0 : index
    %8 = vector.load %arg3[%c0_3, %c0_4] : memref<128x128xbf16, #tpu.memory_space<vmem>>, vector<128x128xbf16>
    %cst = arith.constant dense<0.000000e+00> : vector<8x128xf32>
    %9 = tpu.matmul %6, %8, %cst {dimension_numbers = #tpu.dot_dimension_numbers<[1], [0], [0], [1], [0, 0, 1, 1], [], []>} : vector<8x128xbf16>, vector<128x128xbf16>, vector<8x128xf32> -> vector<8x128xf32>
    %10 = arith.addf %7, %9 : vector<8x128xf32>
    %c0_5 = arith.constant 0 : index
    %c0_6 = arith.constant 0 : index
    %11 = vector.load %arg5[%c0_5, %c0_6] : memref<8x128xf32, #tpu.memory_space<vmem>>, vector<8x128xf32>
    tpu.vector_store %arg5[%c0_5, %c0_6], %10 {strides = array<i32>} : memref<8x128xf32, #tpu.memory_space<vmem>>, vector<8x128xf32>,
    %c0_i32_7 = arith.constant 0 : i32
    %12 = arith.cmpi eq, %arg1, %c0_i32_7 : i32
    %13 = arith.extui %12 : i1 to i32
    %c0_i32_8 = arith.constant 0 : i32
    %14 = arith.cmpi ne, %13, %c0_i32_8 : i32
    scf.if %14 {
      %c0_9 = arith.constant 0 : index
      %c0_10 = arith.constant 0 : index
      %15 = vector.load %arg4[%c0_9, %c0_10] : memref<3x128xf32, #tpu.memory_space<vmem>>, vector<3x128xf32>
      %c0_11 = arith.constant 0 : index
      %c0_12 = arith.constant 0 : index
      %16 = vector.load %arg5[%c0_11, %c0_12] : memref<8x128xf32, #tpu.memory_space<vmem>>, vector<8x128xf32>
      %17 = vector.extract_strided_slice %15 {offsets = [0, 0], sizes = [1, 128], strides = [1, 1]} : vector<3x128xf32> to vector<1x128xf32>
      %18 = vector.broadcast %17 : vector<1x128xf32> to vector<8x128xf32>
      %19 = arith.addf %16, %18 : vector<8x128xf32>
      %cst_13 = arith.constant dense<0.000000e+00> : vector<128xf32>
      %20 = vector.multi_reduction <add>, %19, %cst_13 [0] : vector<8x128xf32> to vector<128xf32>
      %21 = vector.shape_cast %20 : vector<128xf32> to vector<1x128xf32>
      %cst_14 = arith.constant 8.000000e+00 : f32
      %22 = vector.broadcast %cst_14 : f32 to vector<1x128xf32>
      %23 = arith.divf %21, %22 : vector<1x128xf32>
      %24 = vector.broadcast %23 : vector<1x128xf32> to vector<8x128xf32>
      %25 = arith.subf %19, %24 : vector<8x128xf32>
      %26 = arith.mulf %25, %25 : vector<8x128xf32>
      %cst_15 = arith.constant dense<0.000000e+00> : vector<128xf32>
      %27 = vector.multi_reduction <add>, %26, %cst_15 [0] : vector<8x128xf32> to vector<128xf32>
      %28 = vector.shape_cast %27 : vector<128xf32> to vector<1x128xf32>
      %cst_16 = arith.constant 8.000000e+00 : f32
      %29 = vector.broadcast %cst_16 : f32 to vector<1x128xf32>
      %30 = arith.divf %28, %29 : vector<1x128xf32>
      %31 = vector.extract_strided_slice %15 {offsets = [1, 0], sizes = [1, 128], strides = [1, 1]} : vector<3x128xf32> to vector<1x128xf32>
      %cst_17 = arith.constant 9.99999974E-6 : f32
      %32 = vector.broadcast %cst_17 : f32 to vector<1x128xf32>
      %33 = arith.addf %30, %32 : vector<1x128xf32>
      %34 = math.rsqrt %33 : vector<1x128xf32>
      %35 = arith.mulf %31, %34 : vector<1x128xf32>
      %36 = vector.broadcast %35 : vector<1x128xf32> to vector<8x128xf32>
      %37 = arith.mulf %36, %25 : vector<8x128xf32>
      %38 = vector.extract_strided_slice %15 {offsets = [2, 0], sizes = [1, 128], strides = [1, 1]} : vector<3x128xf32> to vector<1x128xf32>
      %39 = vector.broadcast %38 : vector<1x128xf32> to vector<8x128xf32>
      %40 = arith.addf %37, %39 : vector<8x128xf32>
      %cst_18 = arith.constant 0.000000e+00 : f32
      %41 = vector.broadcast %cst_18 : f32 to vector<8x128xf32>
      %42 = arith.cmpf oge, %40, %41 : vector<8x128xf32>
      %cst_19 = arith.constant 0.00999999977 : f32
      %43 = vector.broadcast %cst_19 : f32 to vector<8x128xf32>
      %44 = arith.mulf %43, %40 : vector<8x128xf32>
      %45 = arith.select %42, %40, %44 : vector<8x128xi1>, vector<8x128xf32>
      %c0_20 = arith.constant 0 : index
      %c0_21 = arith.constant 0 : index
      %46 = vector.load %arg5[%c0_20, %c0_21] : memref<8x128xf32, #tpu.memory_space<vmem>>, vector<8x128xf32>
      tpu.vector_store %arg5[%c0_20, %c0_21], %45 {strides = array<i32>} : memref<8x128xf32, #tpu.memory_space<vmem>>, vector<8x128xf32>,
    } else {
    }
    return
  }
  func.func @transform_0(%arg0: i32, %arg1: i32) -> (i32, i32) {
    %c0_i32 = arith.constant 0 : i32
    %c0_i32_0 = arith.constant 0 : i32
    %c0_i32_1 = arith.constant 0 : i32
    return %c0_i32, %c0_i32_0 : i32, i32
  }
  func.func @transform_1(%arg0: i32, %arg1: i32) -> (i32, i32) {
    %c0_i32 = arith.constant 0 : i32
    return %arg1, %arg0 : i32, i32
  }
  func.func @transform_2(%arg0: i32, %arg1: i32) -> (i32, i32) {
    %c0_i32 = arith.constant 0 : i32
    %c0_i32_0 = arith.constant 0 : i32
    return %c0_i32, %arg0 : i32, i32
  }
  func.func @transform_3(%arg0: i32, %arg1: i32) -> (i32, i32) {
    %c0_i32 = arith.constant 0 : i32
    %c0_i32_0 = arith.constant 0 : i32
    return %c0_i32, %arg0 : i32, i32
  }
}

</mosaic_0001>

<bundles_post_ra>
// kernel: tpu_custom_call.1
= control target key start
LH: loop header
LB: loop body
LE: loop exit
PB: predicated region body
PF: predicated region fallthrough
CT: control target
= control target key end

     0   :  { %8 = vsyncpa [#allocation3], 0  ;;  %s414_s0 = inlined_call_operand.hbm [shape: bf16[8,128], index: 0, kind: input, shape index: {}]   ;;  %s415_s1 = inlined_call_operand.hbm [shape: bf16[128,128], index: 1, kind: input, shape index: {}]   ;;  %s416_s2 = inlined_call_operand.hbm [shape: f32[3,128], index: 2, kind: input, shape index: {}]   ;;  %s417_s3 = inlined_call_operand.hbm [shape: f32[8,128], index: 3, kind: output, shape index: {}]  }
   0x1   :  { %9 = vsyncpa [#allocation6], 0 }
   0x2   :  { %10 = vsyncpa [#allocation4], 0  ;;  %s374_s12 = smov [#allocation5]  }
   0x3   :  { %s26_s13 = sshll.u32 %s374_s12, 4  ;;  %s27_s13 = int_to_ptr.vmem [resolvable:$true] %s26_s13 }
   0x4   :  { %s296_s14 = scalar_lea.vmem %s27_s13, 1024  ;;  %p301_p1 = scmp.lt.s32.totalorder %s27_s13, %s27_s13 }
   0x5   :  { %p297_p0 = scmp.ne.s32.totalorder %s27_s13, %s296_s14  ;;  %p302_p2 = scmp.lt.s32.totalorder %s296_s14, %s296_s14 }
   0x7   :  { %p303_p3 = por %p302_p2, %p301_p1 }
   0x9   :  { %p304_p4 = pnand %p303_p3, %p297_p0 }
   0xb   :  { %307 = shalt.err (!%p304_p4)
}
   0xc   :  { %s375_s15 = smov 64   ;;  %s376_s16 = smov 4  }
   0xd   :  { %32 = dma.hbm_to_vmem [thread:$0]  %s415_s1, 1024, %s27_s13, [#allocation6], %s375_s15, %s375_s15, %s376_s16  }
   0xe   :  { %s377_s19 = smov [#allocation2]   ;;  %s378_s21 = smov [#allocation7]  }
   0xf   :  { %s17_s20 = sshll.u32 %s377_s19, 4  ;;  %s39_s22 = sshll.u32 %s378_s21, 4  ;;  %s18_s20 = int_to_ptr.vmem [resolvable:$true] %s17_s20  ;;  %s40_s22 = int_to_ptr.vmem [resolvable:$true] %s39_s22 }
  0x10   :  { %s316_s23 = scalar_lea.vmem %s18_s20, 64  ;;  %p321_p6 = scmp.lt.s32.totalorder %s18_s20, %s18_s20 }
  0x11   :  { %p317_p5 = scmp.ne.s32.totalorder %s18_s20, %s316_s23  ;;  %p322_p7 = scmp.lt.s32.totalorder %s316_s23, %s316_s23 }
  0x13   :  { %p323_p8 = por %p322_p7, %p321_p6 }
  0x15   :  { %p324_p9 = pnand %p323_p8, %p317_p5 }
  0x17   :  { %327 = shalt.err (!%p324_p9)
}
  0x18   :  { %20 = dma.hbm_to_vmem [thread:$0]  %s414_s0, 64, %s18_s20, [#allocation3]  }
  0x19   :  { %s336_s26 = scalar_lea.vmem %s40_s22, 64  ;;  %p341_p11 = scmp.lt.s32.totalorder %s40_s22, %s40_s22 }
  0x1a   :  { %p337_p10 = scmp.ne.s32.totalorder %s40_s22, %s336_s26  ;;  %p342_p12 = scmp.lt.s32.totalorder %s336_s26, %s336_s26 }
  0x1c   :  { %p343_p13 = por %p342_p12, %p341_p11 }
  0x1e   :  { %p344_p0 = pnand %p343_p13, %p337_p10 }
  0x20   :  { %347 = shalt.err (!%p344_p0)
}
  0x21   :  { %42 = dma.hbm_to_vmem [thread:$0]  %s416_s2, 64, %s40_s22, [#allocation6]  }
  0x22   :  { %368 = dma.done.wait [#allocation3], 64  }
  0x23   :  { %369 = vsyncadd [#allocation3], 4294967232 }
  0x24   :  { %370 = dma.done.wait [#allocation6], 1088  }
  0x25   :  { %371 = vsyncadd [#allocation6], 4294966208  ;;  %v379_v0 = vmov 0.0   ;;  %vm380_vm0 = vmmov 0   ;;  %v278_v1 = vld [vmem:[#allocation5 + $0x38] sm:$0xff]   ;;  %v279_v2 = vld [vmem:[#allocation5 + $0x30] sm:$0xff]   ;;  %v176_v10 = vlaneseq }
  0x26   :  { %250 = vmatprep.subr.bf16.mxu0 %v379_v0  ;;  %266 = vmatprep.mubr.msk.bf16.mxu0 %vm380_vm0, %v379_v0  ;;  %v280_v3 = vld [vmem:[#allocation5 + $0x28] sm:$0xff]   ;;  %v281_v4 = vld [vmem:[#allocation5 + $0x20] sm:$0xff]   ;;  %v282_v5 = vld [vmem:[#allocation5 + $0x18] sm:$0xff]   ;;  %s381_s0 = smov [#allocation8]  }
  0x27   :  { %251 = vmatpush3.bf16.msra.mxu0 %v278_v1  ;;  %v283_v6 = vld [vmem:[#allocation5 + $0x10] sm:$0xff]   ;;  %v284_v7 = vld [vmem:[#allocation5 + $0x8] sm:$0xff]   ;;  %v285_v8 = vld [vmem:[#allocation5] sm:$0xff]   ;;  %v177_v11 = vshrl.u32 %v176_v10, 7  ;;  %s221_s2 = sshll.u32 %s381_s0, 4  ;;  %s222_s2 = int_to_ptr.vmem [resolvable:$true] %s221_s2 }
  0x28   :  { %252 = vmatprep.subr.bf16.mxu0 %v379_v0  ;;  %v63_v9 = vld [vmem:[#allocation2] sm:$0xf]  ;;  %v174_v13 = vld [vmem:[#allocation7] sm:$0x7]  ;;  %s348_s28 = scalar_lea.vmem %s222_s2, 128  ;;  %p353_p2 = scmp.lt.s32.totalorder %s222_s2, %s222_s2 }
  0x29   :  { %v178_v12 = vsub.s32 0, %v177_v11  ;;  %v203_v37 = vsub.s32 1, %v177_v11  ;;  %v208_v38 = vsub.s32 2, %v177_v11  ;;  %p349_p1 = scmp.ne.s32.totalorder %s222_s2, %s348_s28  ;;  %p354_p3 = scmp.lt.s32.totalorder %s348_s28, %s348_s28 }
  0x2b   :  { %253 = vmatpush3.bf16.msra.mxu0 %v279_v2  ;;  %v179_v14 = vrot.slane %v174_v13, %v178_v12  ;;  %v209_v42 = vrot.slane %v174_v13, %v208_v38  ;;  %p355_p4 = por %p354_p3, %p353_p2 }
  0x2c   :  { %254 = vmatprep.subr.bf16.mxu0 %v379_v0 }
  0x2d   :  { %p356_p5 = pnand %p355_p4, %p349_p1 }
  0x2f   :  { %255 = vmatpush3.bf16.msra.mxu0 %v280_v3 }
  0x30   :  { %256 = vmatprep.subr.bf16.mxu0 %v379_v0 }
  0x33   :  { %257 = vmatpush3.bf16.msra.mxu0 %v281_v4 }
  0x34   :  { %258 = vmatprep.subr.bf16.mxu0 %v379_v0 }
  0x37   :  { %259 = vmatpush3.bf16.msra.mxu0 %v282_v5 }
  0x38   :  { %260 = vmatprep.subr.bf16.mxu0 %v379_v0 }
  0x3b   :  { %261 = vmatpush3.bf16.msra.mxu0 %v283_v6 }
  0x3c   :  { %262 = vmatprep.subr.bf16.mxu0 %v379_v0 }
  0x3f   :  { %263 = vmatpush3.bf16.msra.mxu0 %v284_v7 }
  0x40   :  { %264 = vmatprep.subr.bf16.mxu0 %v379_v0 }
  0x43   :  { %265 = vmatpush3.bf16.msra.mxu0 %v285_v8 }
  0x46   :  { %267 = vmatmul.mubr.bf16.vlgmr.msra.gmra.mxu0 %v63_v9 }
 0x106   :  { %v163_v15 = vpop.f32.mrf.mxu0 }
 0x107   :  { %v180_v17 = vadd.f32 %v179_v14, %v163_v15 }
 0x108   :  { %v268_v16 = vpop.f32.mrf.mxu0 }
 0x109   :  { %v181_v19 = vrot.slane %v180_v17, 4 }
 0x10a   :  { %v166_v18 = vpop.f32.mrf.mxu0 }
 0x10b   :  { %v182_v21 = vadd.f32 %v181_v19, %v180_v17 }
 0x10c   :  { %v269_v20 = vpop.f32.mrf.mxu0 }
 0x10d   :  { %v183_v22 = vrot.slane %v182_v21, 2 }
 0x10f   :  { %v184_v23 = vadd.f32 %v183_v22, %v182_v21 }
 0x111   :  { %v185_v24 = vrot.slane %v184_v23, 1 }
 0x113   :  { %v186_v25 = vadd.f32 %v185_v24, %v184_v23 }
 0x115   :  { %v188_v26 = vmul.f32 0.125, %v186_v25 }
 0x117   :  { %v189_v27 = vsub.f32 %v180_v17, %v188_v26 }
 0x119   :  { %v190_v28 = vmul.f32 %v189_v27, %v189_v27 }
 0x11b   :  { %v191_v29 = vrot.slane %v190_v28, 4 }
 0x11d   :  { %v192_v30 = vadd.f32 %v191_v29, %v190_v28 }
 0x11f   :  { %v193_v31 = vrot.slane %v192_v30, 2 }
 0x121   :  { %v194_v32 = vadd.f32 %v193_v31, %v192_v30 }
 0x123   :  { %v195_v33 = vrot.slane %v194_v32, 1 }
 0x125   :  { %v196_v34 = vadd.f32 %v195_v33, %v194_v32 }
 0x127   :  { %v197_v35 = vmul.f32 0.125, %v196_v34 }
 0x129   :  { %v198_v36 = vadd.f32 1e-05, %v197_v35 }
 0x12b   :  { %286 = vrsqrt.f32 %v198_v36 }
 0x138   :  { %v287_v39 = vpop.eup %286 }
 0x139   :  { %v200_v40 = vmul.f32 %v287_v39, %v174_v13 }
 0x13b   :  { %v204_v41 = vrot.slane %v200_v40, %v203_v37 }
 0x13d   :  { %v205_v43 = vmul.f32 %v204_v41, %v189_v27 }
 0x13f   :  { %v210_v44 = vadd.f32 %v209_v42, %v205_v43 }
 0x141   :  { %vm211_vm1 = vcmp.ge.f32.partialorder %v210_v44, 0.0  ;;  %v212_v45 = vmul.f32 0.01, %v210_v44 }
 0x143   :  { %v213_v46 = vsel %vm211_vm1, %v210_v44, %v212_v45 }
 0x144   :  { %214 = vst [vmem:[#allocation8] sm:$0xff] %v213_v46 }
 0x145   :  { %359 = shalt.err (!%p356_p5)
}
 0x146   :  { %224 = dma.vmem_to_hbm [thread:$0]  %s222_s2, 128, %s417_s3, [#allocation4]  }
 0x147   :  { %372 = dma.done.wait [#allocation4], 128  }
 0x148   :  { %373 = vsyncadd [#allocation4], 4294967168 }
 0x149   :  { %228 = vsyncpa [#allocation3], 1 }
 0x14a   :  { %229 = vsyncpa [#allocation6], 1 }
 0x14b   :  { %230 = vsyncpa [#allocation4], 1 }

</bundles_post_ra>
